<compile_context>
chip_gen: v6e
topology: v6e:2x2x1
jax: 0.10.0
libtpu: 0.0.40
codegen_flags: <defaults>
</compile_context>

<pallas_src>
import math
import functools

import jax
import jax.numpy as jnp
from jax import lax
from jax.experimental import pallas as pl
from jax.experimental.pallas import tpu as pltpu


def _layer_norm(x, gamma, beta, eps=1e-5):
    # PyTorch nn.LayerNorm semantics (biased variance, eps inside rsqrt).
    mu = jnp.mean(x, axis=-1, keepdims=True)
    var = jnp.mean((x - mu) ** 2, axis=-1, keepdims=True)
    return (x - mu) * lax.rsqrt(var + eps) * gamma + beta


def _encoder_block_kernel(
    x_ref, mask_ref,
    wq_ref, bq_ref, wk_ref, bk_ref, wv_ref, bv_ref, wo_ref, bo_ref,
    g1_ref, be1_ref, w1_ref, bf1_ref, w2_ref, bf2_ref, g2_ref, be2_ref,
    o_ref, *, num_heads,
):
    x = x_ref[0]           # (S, D)
    mask = mask_ref[0]     # (1, S) — broadcasts over query rows and heads
    D = x.shape[-1]
    dh = D // num_heads
    inv_sqrt_dh = 1.0 / math.sqrt(dh)

    # ---- Multi-head self-attention (fully VMEM-resident, matmuls on the MXU) ----
    q = jnp.dot(x, wq_ref[...], preferred_element_type=jnp.float32) + bq_ref[...]
    k = jnp.dot(x, wk_ref[...], preferred_element_type=jnp.float32) + bk_ref[...]
    v = jnp.dot(x, wv_ref[...], preferred_element_type=jnp.float32) + bv_ref[...]

    mask_bias = mask * (-1e9)   # (1, S)

    head_outs = []
    for h in range(num_heads):          # static loop -> static lane slices
        sl = slice(h * dh, (h + 1) * dh)
        qh, kh, vh = q[:, sl], k[:, sl], v[:, sl]
        logits = jnp.dot(qh, kh.T, preferred_element_type=jnp.float32) * inv_sqrt_dh
        logits = logits + mask_bias
        m = jnp.max(logits, axis=-1, keepdims=True)
        p = jnp.exp(logits - m)
        w = p / jnp.sum(p, axis=-1, keepdims=True)
        head_outs.append(jnp.dot(w, vh, preferred_element_type=jnp.float32))
    concat = jnp.concatenate(head_outs, axis=-1)   # (S, D)

    attn = jnp.dot(concat, wo_ref[...], preferred_element_type=jnp.float32) + bo_ref[...]

    # TODO(synk): dropout_1 / dropout_2 are identity here (inference mode).
    h1 = x + attn
    n1 = _layer_norm(h1, g1_ref[...], be1_ref[...])

    # ---- Feed-forward: Linear -> ReLU -> Linear ----
    hidden = jnp.dot(n1, w1_ref[...], preferred_element_type=jnp.float32) + bf1_ref[...]
    hidden = jnp.maximum(hidden, 0.0)
    ff = jnp.dot(hidden, w2_ref[...], preferred_element_type=jnp.float32) + bf2_ref[...]

    out = _layer_norm(n1 + ff, g2_ref[...], be2_ref[...])
    o_ref[0] = out.astype(o_ref.dtype)


def encoder_block_forward(x, padding_mask, params, *, num_heads):
    """Fused EncoderBlock forward.

    x:            (B, S, D) float32
    padding_mask: (B, S)    float32 (1.0 at padded key positions, else 0.0)
    params:       dict of weight matrices (in, out) and (1, dim) biases/affines.
    """
    B, S, D = x.shape
    Fh = params["w1"].shape[-1]
    assert D % num_heads == 0

    mask3 = padding_mask.reshape(B, 1, S).astype(x.dtype)

    def const2(shape):
        return pl.BlockSpec(shape, lambda b: (0, 0))

    in_specs = [
        pl.BlockSpec((1, S, D), lambda b: (b, 0, 0)),   # x  (one batch row per step)
        pl.BlockSpec((1, 1, S), lambda b: (b, 0, 0)),   # padding mask
        const2((D, D)), const2((1, D)),                 # wq, bq
        const2((D, D)), const2((1, D)),                 # wk, bk
        const2((D, D)), const2((1, D)),                 # wv, bv
        const2((D, D)), const2((1, D)),                 # wo, bo
        const2((1, D)), const2((1, D)),                 # ln1 gamma, beta
        const2((D, Fh)), const2((1, Fh)),               # ff w1, b1
        const2((Fh, D)), const2((1, D)),                # ff w2, b2
        const2((1, D)), const2((1, D)),                 # ln2 gamma, beta
    ]

    kernel = functools.partial(_encoder_block_kernel, num_heads=num_heads)

    return pl.pallas_call(
        kernel,
        out_shape=jax.ShapeDtypeStruct((B, S, D), x.dtype),
        grid=(B,),
        in_specs=in_specs,
        out_specs=pl.BlockSpec((1, S, D), lambda b: (b, 0, 0)),
        compiler_params=pltpu.CompilerParams(
            dimension_semantics=("parallel",),   # batch axis splits across TCs on v7x
        ),
    )(
        x, mask3,
        params["wq"], params["bq"],
        params["wk"], params["bk"],
        params["wv"], params["bv"],
        params["wo"], params["bo"],
        params["g1"], params["be1"],
        params["w1"], params["bf1"],
        params["w2"], params["bf2"],
        params["g2"], params["be2"],
    )


def encoder_block_reference(x, padding_mask, params, *, num_heads):
    """Pure-JAX reference with the same semantics as the PyTorch EncoderBlock.forward."""
    B, S, D = x.shape
    dh = D // num_heads

    q = x @ params["wq"] + params["bq"]
    k = x @ params["wk"] + params["bk"]
    v = x @ params["wv"] + params["bv"]

    def split(t):
        return t.reshape(B, S, num_heads, dh).transpose(0, 2, 1, 3)   # (B,H,S,dh)

    qh, kh, vh = split(q), split(k), split(v)
    logits = jnp.einsum("bhqd,bhkd->bhqk", qh, kh) / math.sqrt(dh)
    logits = logits + padding_mask[:, None, None, :] * (-1e9)
    w = jax.nn.softmax(logits, axis=-1)
    o = jnp.einsum("bhqk,bhkd->bhqd", w, vh)
    o = o.transpose(0, 2, 1, 3).reshape(B, S, D)
    attn = o @ params["wo"] + params["bo"]

    n1 = _layer_norm(x + attn, params["g1"], params["be1"])
    ff = jnp.maximum(n1 @ params["w1"] + params["bf1"], 0.0) @ params["w2"] + params["bf2"]
    return _layer_norm(n1 + ff, params["g2"], params["be2"])


if __name__ == "__main__":
    batch, seq, d_model, num_heads, d_ff = 2, 8, 32, 4, 64

    key = jax.random.PRNGKey(0)
    ks = jax.random.split(key, 18)
    s_in = 1.0 / math.sqrt(d_model)
    s_ff = 1.0 / math.sqrt(d_ff)

    params = {
        "wq": jax.random.normal(ks[0], (d_model, d_model), jnp.float32) * s_in,
        "bq": jax.random.normal(ks[1], (1, d_model), jnp.float32) * 0.1,
        "wk": jax.random.normal(ks[2], (d_model, d_model), jnp.float32) * s_in,
        "bk": jax.random.normal(ks[3], (1, d_model), jnp.float32) * 0.1,
        "wv": jax.random.normal(ks[4], (d_model, d_model), jnp.float32) * s_in,
        "bv": jax.random.normal(ks[5], (1, d_model), jnp.float32) * 0.1,
        "wo": jax.random.normal(ks[6], (d_model, d_model), jnp.float32) * s_in,
        "bo": jax.random.normal(ks[7], (1, d_model), jnp.float32) * 0.1,
        "g1": 1.0 + jax.random.normal(ks[8], (1, d_model), jnp.float32) * 0.05,
        "be1": jax.random.normal(ks[9], (1, d_model), jnp.float32) * 0.05,
        "w1": jax.random.normal(ks[10], (d_model, d_ff), jnp.float32) * s_in,
        "bf1": jax.random.normal(ks[11], (1, d_ff), jnp.float32) * 0.1,
        "w2": jax.random.normal(ks[12], (d_ff, d_model), jnp.float32) * s_ff,
        "bf2": jax.random.normal(ks[13], (1, d_model), jnp.float32) * 0.1,
        "g2": 1.0 + jax.random.normal(ks[14], (1, d_model), jnp.float32) * 0.05,
        "be2": jax.random.normal(ks[15], (1, d_model), jnp.float32) * 0.05,
    }

    x = jax.random.normal(ks[16], (batch, seq, d_model), jnp.float32)
    # Pad the last two key positions of batch element 1.
    padding_mask = jnp.zeros((batch, seq), jnp.float32).at[1, -2:].set(1.0)

    out = encoder_block_forward(x, padding_mask, params, num_heads=num_heads)
    out = jax.block_until_ready(out)

    ref = encoder_block_reference(x, padding_mask, params, num_heads=num_heads)
    assert out.shape == (batch, seq, d_model)
    assert jnp.allclose(out, ref, atol=2e-4, rtol=2e-4), float(jnp.max(jnp.abs(out - ref)))

    print("KERNEL_OK")
</pallas_src>

<mosaic_0001>
module attributes {stable_mosaic.version = 11 : i64} {
  func.func @_encoder_block_kernel(%arg0: i32, %arg1: memref<1x8x32xf32, #tpu.memory_space<vmem>>, %arg2: memref<1x1x8xf32, #tpu.memory_space<vmem>>, %arg3: memref<32x32xf32, #tpu.memory_space<vmem>>, %arg4: memref<1x32xf32, #tpu.memory_space<vmem>>, %arg5: memref<32x32xf32, #tpu.memory_space<vmem>>, %arg6: memref<1x32xf32, #tpu.memory_space<vmem>>, %arg7: memref<32x32xf32, #tpu.memory_space<vmem>>, %arg8: memref<1x32xf32, #tpu.memory_space<vmem>>, %arg9: memref<32x32xf32, #tpu.memory_space<vmem>>, %arg10: memref<1x32xf32, #tpu.memory_space<vmem>>, %arg11: memref<1x32xf32, #tpu.memory_space<vmem>>, %arg12: memref<1x32xf32, #tpu.memory_space<vmem>>, %arg13: memref<32x64xf32, #tpu.memory_space<vmem>>, %arg14: memref<1x64xf32, #tpu.memory_space<vmem>>, %arg15: memref<64x32xf32, #tpu.memory_space<vmem>>, %arg16: memref<1x32xf32, #tpu.memory_space<vmem>>, %arg17: memref<1x32xf32, #tpu.memory_space<vmem>>, %arg18: memref<1x32xf32, #tpu.memory_space<vmem>>, %arg19: memref<1x8x32xf32, #tpu.memory_space<vmem>>) attributes {dimension_semantics = [#tpu.dimension_semantics<parallel>], iteration_bounds = array<i64: 2>, scalar_prefetch = 0 : i64, scratch_operands = 0 : i64, tpu.core_type = #tpu.core_type<tc>, window_params = [{transform_indices = @transform_0, window_bounds = array<i64: 1, 8, 32>}, {transform_indices = @transform_1, window_bounds = array<i64: 1, 1, 8>}, {pipeline_mode = #tpu.pipeline_mode<synchronous>, transform_indices = @transform_2, window_bounds = array<i64: 32, 32>}, {pipeline_mode = #tpu.pipeline_mode<synchronous>, transform_indices = @transform_3, window_bounds = array<i64: 1, 32>}, {pipeline_mode = #tpu.pipeline_mode<synchronous>, transform_indices = @transform_4, window_bounds = array<i64: 32, 32>}, {pipeline_mode = #tpu.pipeline_mode<synchronous>, transform_indices = @transform_5, window_bounds = array<i64: 1, 32>}, {pipeline_mode = #tpu.pipeline_mode<synchronous>, transform_indices = @transform_6, window_bounds = array<i64: 32, 32>}, {pipeline_mode = #tpu.pipeline_mode<synchronous>, transform_indices = @transform_7, window_bounds = array<i64: 1, 32>}, {pipeline_mode = #tpu.pipeline_mode<synchronous>, transform_indices = @transform_8, window_bounds = array<i64: 32, 32>}, {pipeline_mode = #tpu.pipeline_mode<synchronous>, transform_indices = @transform_9, window_bounds = array<i64: 1, 32>}, {pipeline_mode = #tpu.pipeline_mode<synchronous>, transform_indices = @transform_10, window_bounds = array<i64: 1, 32>}, {pipeline_mode = #tpu.pipeline_mode<synchronous>, transform_indices = @transform_11, window_bounds = array<i64: 1, 32>}, {pipeline_mode = #tpu.pipeline_mode<synchronous>, transform_indices = @transform_12, window_bounds = array<i64: 32, 64>}, {pipeline_mode = #tpu.pipeline_mode<synchronous>, transform_indices = @transform_13, window_bounds = array<i64: 1, 64>}, {pipeline_mode = #tpu.pipeline_mode<synchronous>, transform_indices = @transform_14, window_bounds = array<i64: 64, 32>}, {pipeline_mode = #tpu.pipeline_mode<synchronous>, transform_indices = @transform_15, window_bounds = array<i64: 1, 32>}, {pipeline_mode = #tpu.pipeline_mode<synchronous>, transform_indices = @transform_16, window_bounds = array<i64: 1, 32>}, {pipeline_mode = #tpu.pipeline_mode<synchronous>, transform_indices = @transform_17, window_bounds = array<i64: 1, 32>}, {transform_indices = @transform_18, window_bounds = array<i64: 1, 8, 32>}]} {
    %c0 = arith.constant 0 : index
    %c0_0 = arith.constant 0 : index
    %c0_1 = arith.constant 0 : index
    %0 = vector.load %arg1[%c0, %c0_0, %c0_1] : memref<1x8x32xf32, #tpu.memory_space<vmem>>, vector<1x8x32xf32>
    %1 = vector.shape_cast %0 : vector<1x8x32xf32> to vector<8x32xf32>
    %c0_2 = arith.constant 0 : index
    %c0_3 = arith.constant 0 : index
    %c0_4 = arith.constant 0 : index
    %2 = vector.load %arg2[%c0_2, %c0_3, %c0_4] : memref<1x1x8xf32, #tpu.memory_space<vmem>>, vector<1x1x8xf32>
    %3 = vector.shape_cast %2 : vector<1x1x8xf32> to vector<1x8xf32>
    %c0_5 = arith.constant 0 : index
    %c0_6 = arith.constant 0 : index
    %4 = vector.load %arg3[%c0_5, %c0_6] : memref<32x32xf32, #tpu.memory_space<vmem>>, vector<32x32xf32>
    %cst = arith.constant dense<0.000000e+00> : vector<8x32xf32>
    %5 = tpu.matmul %1, %4, %cst {dimension_numbers = #tpu.dot_dimension_numbers<[1], [0], [0], [1], [0, 0, 1, 1], [], []>} : vector<8x32xf32>, vector<32x32xf32>, vector<8x32xf32> -> vector<8x32xf32>
    %c0_7 = arith.constant 0 : index
    %c0_8 = arith.constant 0 : index
    %6 = vector.load %arg4[%c0_7, %c0_8] : memref<1x32xf32, #tpu.memory_space<vmem>>, vector<1x32xf32>
    %7 = vector.broadcast %6 : vector<1x32xf32> to vector<8x32xf32>
    %8 = arith.addf %5, %7 : vector<8x32xf32>
    %c0_9 = arith.constant 0 : index
    %c0_10 = arith.constant 0 : index
    %9 = vector.load %arg5[%c0_9, %c0_10] : memref<32x32xf32, #tpu.memory_space<vmem>>, vector<32x32xf32>
    %cst_11 = arith.constant dense<0.000000e+00> : vector<8x32xf32>
    %10 = tpu.matmul %1, %9, %cst_11 {dimension_numbers = #tpu.dot_dimension_numbers<[1], [0], [0], [1], [0, 0, 1, 1], [], []>} : vector<8x32xf32>, vector<32x32xf32>, vector<8x32xf32> -> vector<8x32xf32>
    %c0_12 = arith.constant 0 : index
    %c0_13 = arith.constant 0 : index
    %11 = vector.load %arg6[%c0_12, %c0_13] : memref<1x32xf32, #tpu.memory_space<vmem>>, vector<1x32xf32>
    %12 = vector.broadcast %11 : vector<1x32xf32> to vector<8x32xf32>
    %13 = arith.addf %10, %12 : vector<8x32xf32>
    %c0_14 = arith.constant 0 : index
    %c0_15 = arith.constant 0 : index
    %14 = vector.load %arg7[%c0_14, %c0_15] : memref<32x32xf32, #tpu.memory_space<vmem>>, vector<32x32xf32>
    %cst_16 = arith.constant dense<0.000000e+00> : vector<8x32xf32>
    %15 = tpu.matmul %1, %14, %cst_16 {dimension_numbers = #tpu.dot_dimension_numbers<[1], [0], [0], [1], [0, 0, 1, 1], [], []>} : vector<8x32xf32>, vector<32x32xf32>, vector<8x32xf32> -> vector<8x32xf32>
    %c0_17 = arith.constant 0 : index
    %c0_18 = arith.constant 0 : index
    %16 = vector.load %arg8[%c0_17, %c0_18] : memref<1x32xf32, #tpu.memory_space<vmem>>, vector<1x32xf32>
    %17 = vector.broadcast %16 : vector<1x32xf32> to vector<8x32xf32>
    %18 = arith.addf %15, %17 : vector<8x32xf32>
    %cst_19 = arith.constant -1.000000e+09 : f32
    %19 = vector.broadcast %cst_19 : f32 to vector<1x8xf32>
    %20 = arith.mulf %3, %19 : vector<1x8xf32>
    %21 = vector.extract_strided_slice %8 {offsets = [0, 0], sizes = [8, 8], strides = [1, 1]} : vector<8x32xf32> to vector<8x8xf32>
    %22 = vector.extract_strided_slice %13 {offsets = [0, 0], sizes = [8, 8], strides = [1, 1]} : vector<8x32xf32> to vector<8x8xf32>
    %23 = vector.extract_strided_slice %18 {offsets = [0, 0], sizes = [8, 8], strides = [1, 1]} : vector<8x32xf32> to vector<8x8xf32>
    %24 = tpu.transpose %22, [1, 0] : vector<8x8xf32> -> vector<8x8xf32>
    %cst_20 = arith.constant dense<0.000000e+00> : vector<8x8xf32>
    %25 = tpu.matmul %21, %24, %cst_20 {dimension_numbers = #tpu.dot_dimension_numbers<[1], [0], [0], [1], [0, 0, 1, 1], [], []>} : vector<8x8xf32>, vector<8x8xf32>, vector<8x8xf32> -> vector<8x8xf32>
    %cst_21 = arith.constant 0.353553385 : f32
    %26 = vector.broadcast %cst_21 : f32 to vector<8x8xf32>
    %27 = arith.mulf %25, %26 : vector<8x8xf32>
    %28 = vector.broadcast %20 : vector<1x8xf32> to vector<8x8xf32>
    %29 = arith.addf %27, %28 : vector<8x8xf32>
    %cst_22 = arith.constant dense<0xFF800000> : vector<8xf32>
    %30 = vector.multi_reduction <maximumf>, %29, %cst_22 [1] : vector<8x8xf32> to vector<8xf32>
    %31 = vector.shape_cast %30 : vector<8xf32> to vector<8x1xf32>
    %32 = vector.broadcast %31 : vector<8x1xf32> to vector<8x8xf32>
    %33 = arith.subf %29, %32 : vector<8x8xf32>
    %34 = math.exp %33 : vector<8x8xf32>
    %cst_23 = arith.constant dense<0.000000e+00> : vector<8xf32>
    %35 = vector.multi_reduction <add>, %34, %cst_23 [1] : vector<8x8xf32> to vector<8xf32>
    %36 = vector.shape_cast %35 : vector<8xf32> to vector<8x1xf32>
    %37 = vector.broadcast %36 : vector<8x1xf32> to vector<8x8xf32>
    %38 = arith.divf %34, %37 : vector<8x8xf32>
    %cst_24 = arith.constant dense<0.000000e+00> : vector<8x8xf32>
    %39 = tpu.matmul %38, %23, %cst_24 {dimension_numbers = #tpu.dot_dimension_numbers<[1], [0], [0], [1], [0, 0, 1, 1], [], []>} : vector<8x8xf32>, vector<8x8xf32>, vector<8x8xf32> -> vector<8x8xf32>
    %40 = vector.extract_strided_slice %8 {offsets = [0, 8], sizes = [8, 8], strides = [1, 1]} : vector<8x32xf32> to vector<8x8xf32>
    %41 = vector.extract_strided_slice %13 {offsets = [0, 8], sizes = [8, 8], strides = [1, 1]} : vector<8x32xf32> to vector<8x8xf32>
    %42 = vector.extract_strided_slice %18 {offsets = [0, 8], sizes = [8, 8], strides = [1, 1]} : vector<8x32xf32> to vector<8x8xf32>
    %43 = tpu.transpose %41, [1, 0] : vector<8x8xf32> -> vector<8x8xf32>
    %cst_25 = arith.constant dense<0.000000e+00> : vector<8x8xf32>
    %44 = tpu.matmul %40, %43, %cst_25 {dimension_numbers = #tpu.dot_dimension_numbers<[1], [0], [0], [1], [0, 0, 1, 1], [], []>} : vector<8x8xf32>, vector<8x8xf32>, vector<8x8xf32> -> vector<8x8xf32>
    %cst_26 = arith.constant 0.353553385 : f32
    %45 = vector.broadcast %cst_26 : f32 to vector<8x8xf32>
    %46 = arith.mulf %44, %45 : vector<8x8xf32>
    %47 = vector.broadcast %20 : vector<1x8xf32> to vector<8x8xf32>
    %48 = arith.addf %46, %47 : vector<8x8xf32>
    %cst_27 = arith.constant dense<0xFF800000> : vector<8xf32>
    %49 = vector.multi_reduction <maximumf>, %48, %cst_27 [1] : vector<8x8xf32> to vector<8xf32>
    %50 = vector.shape_cast %49 : vector<8xf32> to vector<8x1xf32>
    %51 = vector.broadcast %50 : vector<8x1xf32> to vector<8x8xf32>
    %52 = arith.subf %48, %51 : vector<8x8xf32>
    %53 = math.exp %52 : vector<8x8xf32>
    %cst_28 = arith.constant dense<0.000000e+00> : vector<8xf32>
    %54 = vector.multi_reduction <add>, %53, %cst_28 [1] : vector<8x8xf32> to vector<8xf32>
    %55 = vector.shape_cast %54 : vector<8xf32> to vector<8x1xf32>
    %56 = vector.broadcast %55 : vector<8x1xf32> to vector<8x8xf32>
    %57 = arith.divf %53, %56 : vector<8x8xf32>
    %cst_29 = arith.constant dense<0.000000e+00> : vector<8x8xf32>
    %58 = tpu.matmul %57, %42, %cst_29 {dimension_numbers = #tpu.dot_dimension_numbers<[1], [0], [0], [1], [0, 0, 1, 1], [], []>} : vector<8x8xf32>, vector<8x8xf32>, vector<8x8xf32> -> vector<8x8xf32>
    %59 = vector.extract_strided_slice %8 {offsets = [0, 16], sizes = [8, 8], strides = [1, 1]} : vector<8x32xf32> to vector<8x8xf32>
    %60 = vector.extract_strided_slice %13 {offsets = [0, 16], sizes = [8, 8], strides = [1, 1]} : vector<8x32xf32> to vector<8x8xf32>
    %61 = vector.extract_strided_slice %18 {offsets = [0, 16], sizes = [8, 8], strides = [1, 1]} : vector<8x32xf32> to vector<8x8xf32>
    %62 = tpu.transpose %60, [1, 0] : vector<8x8xf32> -> vector<8x8xf32>
    %cst_30 = arith.constant dense<0.000000e+00> : vector<8x8xf32>
    %63 = tpu.matmul %59, %62, %cst_30 {dimension_numbers = #tpu.dot_dimension_numbers<[1], [0], [0], [1], [0, 0, 1, 1], [], []>} : vector<8x8xf32>, vector<8x8xf32>, vector<8x8xf32> -> vector<8x8xf32>
    %cst_31 = arith.constant 0.353553385 : f32
    %64 = vector.broadcast %cst_31 : f32 to vector<8x8xf32>
    %65 = arith.mulf %63, %64 : vector<8x8xf32>
    %66 = vector.broadcast %20 : vector<1x8xf32> to vector<8x8xf32>
    %67 = arith.addf %65, %66 : vector<8x8xf32>
    %cst_32 = arith.constant dense<0xFF800000> : vector<8xf32>
    %68 = vector.multi_reduction <maximumf>, %67, %cst_32 [1] : vector<8x8xf32> to vector<8xf32>
    %69 = vector.shape_cast %68 : vector<8xf32> to vector<8x1xf32>
    %70 = vector.broadcast %69 : vector<8x1xf32> to vector<8x8xf32>
    %71 = arith.subf %67, %70 : vector<8x8xf32>
    %72 = math.exp %71 : vector<8x8xf32>
    %cst_33 = arith.constant dense<0.000000e+00> : vector<8xf32>
    %73 = vector.multi_reduction <add>, %72, %cst_33 [1] : vector<8x8xf32> to vector<8xf32>
    %74 = vector.shape_cast %73 : vector<8xf32> to vector<8x1xf32>
    %75 = vector.broadcast %74 : vector<8x1xf32> to vector<8x8xf32>
    %76 = arith.divf %72, %75 : vector<8x8xf32>
    %cst_34 = arith.constant dense<0.000000e+00> : vector<8x8xf32>
    %77 = tpu.matmul %76, %61, %cst_34 {dimension_numbers = #tpu.dot_dimension_numbers<[1], [0], [0], [1], [0, 0, 1, 1], [], []>} : vector<8x8xf32>, vector<8x8xf32>, vector<8x8xf32> -> vector<8x8xf32>
    %78 = vector.extract_strided_slice %8 {offsets = [0, 24], sizes = [8, 8], strides = [1, 1]} : vector<8x32xf32> to vector<8x8xf32>
    %79 = vector.extract_strided_slice %13 {offsets = [0, 24], sizes = [8, 8], strides = [1, 1]} : vector<8x32xf32> to vector<8x8xf32>
    %80 = vector.extract_strided_slice %18 {offsets = [0, 24], sizes = [8, 8], strides = [1, 1]} : vector<8x32xf32> to vector<8x8xf32>
    %81 = tpu.transpose %79, [1, 0] : vector<8x8xf32> -> vector<8x8xf32>
    %cst_35 = arith.constant dense<0.000000e+00> : vector<8x8xf32>
    %82 = tpu.matmul %78, %81, %cst_35 {dimension_numbers = #tpu.dot_dimension_numbers<[1], [0], [0], [1], [0, 0, 1, 1], [], []>} : vector<8x8xf32>, vector<8x8xf32>, vector<8x8xf32> -> vector<8x8xf32>
    %cst_36 = arith.constant 0.353553385 : f32
    %83 = vector.broadcast %cst_36 : f32 to vector<8x8xf32>
    %84 = arith.mulf %82, %83 : vector<8x8xf32>
    %85 = vector.broadcast %20 : vector<1x8xf32> to vector<8x8xf32>
    %86 = arith.addf %84, %85 : vector<8x8xf32>
    %cst_37 = arith.constant dense<0xFF800000> : vector<8xf32>
    %87 = vector.multi_reduction <maximumf>, %86, %cst_37 [1] : vector<8x8xf32> to vector<8xf32>
    %88 = vector.shape_cast %87 : vector<8xf32> to vector<8x1xf32>
    %89 = vector.broadcast %88 : vector<8x1xf32> to vector<8x8xf32>
    %90 = arith.subf %86, %89 : vector<8x8xf32>
    %91 = math.exp %90 : vector<8x8xf32>
    %cst_38 = arith.constant dense<0.000000e+00> : vector<8xf32>
    %92 = vector.multi_reduction <add>, %91, %cst_38 [1] : vector<8x8xf32> to vector<8xf32>
    %93 = vector.shape_cast %92 : vector<8xf32> to vector<8x1xf32>
    %94 = vector.broadcast %93 : vector<8x1xf32> to vector<8x8xf32>
    %95 = arith.divf %91, %94 : vector<8x8xf32>
    %cst_39 = arith.constant dense<0.000000e+00> : vector<8x8xf32>
    %96 = tpu.matmul %95, %80, %cst_39 {dimension_numbers = #tpu.dot_dimension_numbers<[1], [0], [0], [1], [0, 0, 1, 1], [], []>} : vector<8x8xf32>, vector<8x8xf32>, vector<8x8xf32> -> vector<8x8xf32>
    %97 = tpu.concatenate %39, %58, %77, %96 in 1 : vector<8x8xf32>, vector<8x8xf32>, vector<8x8xf32>, vector<8x8xf32> -> vector<8x32xf32>
    %c0_40 = arith.constant 0 : index
    %c0_41 = arith.constant 0 : index
    %98 = vector.load %arg9[%c0_40, %c0_41] : memref<32x32xf32, #tpu.memory_space<vmem>>, vector<32x32xf32>
    %cst_42 = arith.constant dense<0.000000e+00> : vector<8x32xf32>
    %99 = tpu.matmul %97, %98, %cst_42 {dimension_numbers = #tpu.dot_dimension_numbers<[1], [0], [0], [1], [0, 0, 1, 1], [], []>} : vector<8x32xf32>, vector<32x32xf32>, vector<8x32xf32> -> vector<8x32xf32>
    %c0_43 = arith.constant 0 : index
    %c0_44 = arith.constant 0 : index
    %100 = vector.load %arg10[%c0_43, %c0_44] : memref<1x32xf32, #tpu.memory_space<vmem>>, vector<1x32xf32>
    %101 = vector.broadcast %100 : vector<1x32xf32> to vector<8x32xf32>
    %102 = arith.addf %99, %101 : vector<8x32xf32>
    %103 = arith.addf %1, %102 : vector<8x32xf32>
    %c0_45 = arith.constant 0 : index
    %c0_46 = arith.constant 0 : index
    %104 = vector.load %arg11[%c0_45, %c0_46] : memref<1x32xf32, #tpu.memory_space<vmem>>, vector<1x32xf32>
    %c0_47 = arith.constant 0 : index
    %c0_48 = arith.constant 0 : index
    %105 = vector.load %arg12[%c0_47, %c0_48] : memref<1x32xf32, #tpu.memory_space<vmem>>, vector<1x32xf32>
    %cst_49 = arith.constant dense<0.000000e+00> : vector<8xf32>
    %106 = vector.multi_reduction <add>, %103, %cst_49 [1] : vector<8x32xf32> to vector<8xf32>
    %107 = vector.shape_cast %106 : vector<8xf32> to vector<8x1xf32>
    %cst_50 = arith.constant 3.200000e+01 : f32
    %108 = vector.broadcast %cst_50 : f32 to vector<8x1xf32>
    %109 = arith.divf %107, %108 : vector<8x1xf32>
    %110 = vector.broadcast %109 : vector<8x1xf32> to vector<8x32xf32>
    %111 = arith.subf %103, %110 : vector<8x32xf32>
    %112 = arith.mulf %111, %111 : vector<8x32xf32>
    %cst_51 = arith.constant dense<0.000000e+00> : vector<8xf32>
    %113 = vector.multi_reduction <add>, %112, %cst_51 [1] : vector<8x32xf32> to vector<8xf32>
    %114 = vector.shape_cast %113 : vector<8xf32> to vector<8x1xf32>
    %cst_52 = arith.constant 3.200000e+01 : f32
    %115 = vector.broadcast %cst_52 : f32 to vector<8x1xf32>
    %116 = arith.divf %114, %115 : vector<8x1xf32>
    %117 = vector.broadcast %109 : vector<8x1xf32> to vector<8x32xf32>
    %118 = arith.subf %103, %117 : vector<8x32xf32>
    %cst_53 = arith.constant 9.99999974E-6 : f32
    %119 = vector.broadcast %cst_53 : f32 to vector<8x1xf32>
    %120 = arith.addf %116, %119 : vector<8x1xf32>
    %121 = math.rsqrt %120 : vector<8x1xf32>
    %122 = vector.broadcast %121 : vector<8x1xf32> to vector<8x32xf32>
    %123 = arith.mulf %118, %122 : vector<8x32xf32>
    %124 = vector.broadcast %104 : vector<1x32xf32> to vector<8x32xf32>
    %125 = arith.mulf %123, %124 : vector<8x32xf32>
    %126 = vector.broadcast %105 : vector<1x32xf32> to vector<8x32xf32>
    %127 = arith.addf %125, %126 : vector<8x32xf32>
    %c0_54 = arith.constant 0 : index
    %c0_55 = arith.constant 0 : index
    %128 = vector.load %arg13[%c0_54, %c0_55] : memref<32x64xf32, #tpu.memory_space<vmem>>, vector<32x64xf32>
    %cst_56 = arith.constant dense<0.000000e+00> : vector<8x64xf32>
    %129 = tpu.matmul %127, %128, %cst_56 {dimension_numbers = #tpu.dot_dimension_numbers<[1], [0], [0], [1], [0, 0, 1, 1], [], []>} : vector<8x32xf32>, vector<32x64xf32>, vector<8x64xf32> -> vector<8x64xf32>
    %c0_57 = arith.constant 0 : index
    %c0_58 = arith.constant 0 : index
    %130 = vector.load %arg14[%c0_57, %c0_58] : memref<1x64xf32, #tpu.memory_space<vmem>>, vector<1x64xf32>
    %131 = vector.broadcast %130 : vector<1x64xf32> to vector<8x64xf32>
    %132 = arith.addf %129, %131 : vector<8x64xf32>
    %cst_59 = arith.constant 0.000000e+00 : f32
    %133 = vector.broadcast %cst_59 : f32 to vector<8x64xf32>
    %134 = arith.maximumf %132, %133 : vector<8x64xf32>
    %c0_60 = arith.constant 0 : index
    %c0_61 = arith.constant 0 : index
    %135 = vector.load %arg15[%c0_60, %c0_61] : memref<64x32xf32, #tpu.memory_space<vmem>>, vector<64x32xf32>
    %cst_62 = arith.constant dense<0.000000e+00> : vector<8x32xf32>
    %136 = tpu.matmul %134, %135, %cst_62 {dimension_numbers = #tpu.dot_dimension_numbers<[1], [0], [0], [1], [0, 0, 1, 1], [], []>} : vector<8x64xf32>, vector<64x32xf32>, vector<8x32xf32> -> vector<8x32xf32>
    %c0_63 = arith.constant 0 : index
    %c0_64 = arith.constant 0 : index
    %137 = vector.load %arg16[%c0_63, %c0_64] : memref<1x32xf32, #tpu.memory_space<vmem>>, vector<1x32xf32>
    %138 = vector.broadcast %137 : vector<1x32xf32> to vector<8x32xf32>
    %139 = arith.addf %136, %138 : vector<8x32xf32>
    %140 = arith.addf %127, %139 : vector<8x32xf32>
    %c0_65 = arith.constant 0 : index
    %c0_66 = arith.constant 0 : index
    %141 = vector.load %arg17[%c0_65, %c0_66] : memref<1x32xf32, #tpu.memory_space<vmem>>, vector<1x32xf32>
    %c0_67 = arith.constant 0 : index
    %c0_68 = arith.constant 0 : index
    %142 = vector.load %arg18[%c0_67, %c0_68] : memref<1x32xf32, #tpu.memory_space<vmem>>, vector<1x32xf32>
    %cst_69 = arith.constant dense<0.000000e+00> : vector<8xf32>
    %143 = vector.multi_reduction <add>, %140, %cst_69 [1] : vector<8x32xf32> to vector<8xf32>
    %144 = vector.shape_cast %143 : vector<8xf32> to vector<8x1xf32>
    %cst_70 = arith.constant 3.200000e+01 : f32
    %145 = vector.broadcast %cst_70 : f32 to vector<8x1xf32>
    %146 = arith.divf %144, %145 : vector<8x1xf32>
    %147 = vector.broadcast %146 : vector<8x1xf32> to vector<8x32xf32>
    %148 = arith.subf %140, %147 : vector<8x32xf32>
    %149 = arith.mulf %148, %148 : vector<8x32xf32>
    %cst_71 = arith.constant dense<0.000000e+00> : vector<8xf32>
    %150 = vector.multi_reduction <add>, %149, %cst_71 [1] : vector<8x32xf32> to vector<8xf32>
    %151 = vector.shape_cast %150 : vector<8xf32> to vector<8x1xf32>
    %cst_72 = arith.constant 3.200000e+01 : f32
    %152 = vector.broadcast %cst_72 : f32 to vector<8x1xf32>
    %153 = arith.divf %151, %152 : vector<8x1xf32>
    %154 = vector.broadcast %146 : vector<8x1xf32> to vector<8x32xf32>
    %155 = arith.subf %140, %154 : vector<8x32xf32>
    %cst_73 = arith.constant 9.99999974E-6 : f32
    %156 = vector.broadcast %cst_73 : f32 to vector<8x1xf32>
    %157 = arith.addf %153, %156 : vector<8x1xf32>
    %158 = math.rsqrt %157 : vector<8x1xf32>
    %159 = vector.broadcast %158 : vector<8x1xf32> to vector<8x32xf32>
    %160 = arith.mulf %155, %159 : vector<8x32xf32>
    %161 = vector.broadcast %141 : vector<1x32xf32> to vector<8x32xf32>
    %162 = arith.mulf %160, %161 : vector<8x32xf32>
    %163 = vector.broadcast %142 : vector<1x32xf32> to vector<8x32xf32>
    %164 = arith.addf %162, %163 : vector<8x32xf32>
    %c0_74 = arith.constant 0 : index
    %c0_75 = arith.constant 0 : index
    %c0_76 = arith.constant 0 : index
    %165 = vector.load %arg19[%c0_74, %c0_75, %c0_76] : memref<1x8x32xf32, #tpu.memory_space<vmem>>, vector<1x8x32xf32>
    %166 = vector.shape_cast %165 : vector<1x8x32xf32> to vector<8x32xf32>
    %167 = vector.shape_cast %164 : vector<8x32xf32> to vector<1x8x32xf32>
    tpu.vector_store %arg19[%c0_74, %c0_75, %c0_76], %167 {strides = array<i32>} : memref<1x8x32xf32, #tpu.memory_space<vmem>>, vector<1x8x32xf32>,
    return
  }
  func.func @transform_0(%arg0: i32) -> (i32, i32, i32) {
    %c0_i32 = arith.constant 0 : i32
    %c0_i32_0 = arith.constant 0 : i32
    %c0_i32_1 = arith.constant 0 : i32
    return %arg0, %c0_i32, %c0_i32_0 : i32, i32, i32
  }
  func.func @transform_1(%arg0: i32) -> (i32, i32, i32) {
    %c0_i32 = arith.constant 0 : i32
    %c0_i32_0 = arith.constant 0 : i32
    %c0_i32_1 = arith.constant 0 : i32
    return %arg0, %c0_i32, %c0_i32_0 : i32, i32, i32
  }
  func.func @transform_2(%arg0: i32) -> (i32, i32) {
    %c0_i32 = arith.constant 0 : i32
    %c0_i32_0 = arith.constant 0 : i32
    %c0_i32_1 = arith.constant 0 : i32
    return %c0_i32, %c0_i32_0 : i32, i32
  }
  func.func @transform_3(%arg0: i32) -> (i32, i32) {
    %c0_i32 = arith.constant 0 : i32
    %c0_i32_0 = arith.constant 0 : i32
    %c0_i32_1 = arith.constant 0 : i32
    return %c0_i32, %c0_i32_0 : i32, i32
  }
  func.func @transform_4(%arg0: i32) -> (i32, i32) {
    %c0_i32 = arith.constant 0 : i32
    %c0_i32_0 = arith.constant 0 : i32
    %c0_i32_1 = arith.constant 0 : i32
    return %c0_i32, %c0_i32_0 : i32, i32
  }
  func.func @transform_5(%arg0: i32) -> (i32, i32) {
    %c0_i32 = arith.constant 0 : i32
    %c0_i32_0 = arith.constant 0 : i32
    %c0_i32_1 = arith.constant 0 : i32
    return %c0_i32, %c0_i32_0 : i32, i32
  }
  func.func @transform_6(%arg0: i32) -> (i32, i32) {
    %c0_i32 = arith.constant 0 : i32
    %c0_i32_0 = arith.constant 0 : i32
    %c0_i32_1 = arith.constant 0 : i32
    return %c0_i32, %c0_i32_0 : i32, i32
  }
  func.func @transform_7(%arg0: i32) -> (i32, i32) {
    %c0_i32 = arith.constant 0 : i32
    %c0_i32_0 = arith.constant 0 : i32
    %c0_i32_1 = arith.constant 0 : i32
    return %c0_i32, %c0_i32_0 : i32, i32
  }
  func.func @transform_8(%arg0: i32) -> (i32, i32) {
    %c0_i32 = arith.constant 0 : i32
    %c0_i32_0 = arith.constant 0 : i32
    %c0_i32_1 = arith.constant 0 : i32
    return %c0_i32, %c0_i32_0 : i32, i32
  }
  func.func @transform_9(%arg0: i32) -> (i32, i32) {
    %c0_i32 = arith.constant 0 : i32
    %c0_i32_0 = arith.constant 0 : i32
    %c0_i32_1 = arith.constant 0 : i32
    return %c0_i32, %c0_i32_0 : i32, i32
  }
  func.func @transform_10(%arg0: i32) -> (i32, i32) {
    %c0_i32 = arith.constant 0 : i32
    %c0_i32_0 = arith.constant 0 : i32
    %c0_i32_1 = arith.constant 0 : i32
    return %c0_i32, %c0_i32_0 : i32, i32
  }
  func.func @transform_11(%arg0: i32) -> (i32, i32) {
    %c0_i32 = arith.constant 0 : i32
    %c0_i32_0 = arith.constant 0 : i32
    %c0_i32_1 = arith.constant 0 : i32
    return %c0_i32, %c0_i32_0 : i32, i32
  }
  func.func @transform_12(%arg0: i32) -> (i32, i32) {
    %c0_i32 = arith.constant 0 : i32
    %c0_i32_0 = arith.constant 0 : i32
    %c0_i32_1 = arith.constant 0 : i32
    return %c0_i32, %c0_i32_0 : i32, i32
  }
  func.func @transform_13(%arg0: i32) -> (i32, i32) {
    %c0_i32 = arith.constant 0 : i32
    %c0_i32_0 = arith.constant 0 : i32
    %c0_i32_1 = arith.constant 0 : i32
    return %c0_i32, %c0_i32_0 : i32, i32
  }
  func.func @transform_14(%arg0: i32) -> (i32, i32) {
    %c0_i32 = arith.constant 0 : i32
    %c0_i32_0 = arith.constant 0 : i32
    %c0_i32_1 = arith.constant 0 : i32
    return %c0_i32, %c0_i32_0 : i32, i32
  }
  func.func @transform_15(%arg0: i32) -> (i32, i32) {
    %c0_i32 = arith.constant 0 : i32
    %c0_i32_0 = arith.constant 0 : i32
    %c0_i32_1 = arith.constant 0 : i32
    return %c0_i32, %c0_i32_0 : i32, i32
  }
  func.func @transform_16(%arg0: i32) -> (i32, i32) {
    %c0_i32 = arith.constant 0 : i32
    %c0_i32_0 = arith.constant 0 : i32
    %c0_i32_1 = arith.constant 0 : i32
    return %c0_i32, %c0_i32_0 : i32, i32
  }
  func.func @transform_17(%arg0: i32) -> (i32, i32) {
    %c0_i32 = arith.constant 0 : i32
    %c0_i32_0 = arith.constant 0 : i32
    %c0_i32_1 = arith.constant 0 : i32
    return %c0_i32, %c0_i32_0 : i32, i32
  }
  func.func @transform_18(%arg0: i32) -> (i32, i32, i32) {
    %c0_i32 = arith.constant 0 : i32
    %c0_i32_0 = arith.constant 0 : i32
    %c0_i32_1 = arith.constant 0 : i32
    return %arg0, %c0_i32, %c0_i32_0 : i32, i32, i32
  }
}

</mosaic_0001>

<bundles_post_ra>
// kernel: tpu_custom_call.1
= control target key start
LH: loop header
LB: loop body
LE: loop exit
PB: predicated region body
PF: predicated region fallthrough
CT: control target
= control target key end

     0   :  { %s3067_s0 = inlined_call_operand.hbm [shape: f32[2,8,32], index: 0, kind: input, shape index: {}]   ;;  %s3068_s1 = inlined_call_operand.hbm [shape: f32[2,1,8], index: 1, kind: input, shape index: {}]   ;;  %s3069_s2 = inlined_call_operand.vmem [shape: f32[32,32], index: 2, kind: input, shape index: {}]   ;;  %s3070_s3 = inlined_call_operand.vmem [shape: f32[1,32], index: 3, kind: input, shape index: {}]   ;;  %s3071_s4 = inlined_call_operand.vmem [shape: f32[32,32], index: 4, kind: input, shape index: {}]   ;;  %s3072_s5 = inlined_call_operand.vmem [shape: f32[1,32], index: 5, kind: input, shape index: {}]   ;;  %s3073_s6 = inlined_call_operand.vmem [shape: f32[32,32], index: 6, kind: input, shape index: {}]   ;;  %s3074_s7 = inlined_call_operand.vmem [shape: f32[1,32], index: 7, kind: input, shape index: {}]   ;;  %s3075_s8 = inlined_call_operand.hbm [shape: f32[32,32], index: 8, kind: input, shape index: {}]   ;;  %s3076_s9 = inlined_call_operand.vmem [shape: f32[1,32], index: 9, kind: input, shape index: {}]   ;;  %s3077_s10 = inlined_call_operand.vmem [shape: f32[1,32], index: 10, kind: input, shape index: {}]   ;;  %s3078_s11 = inlined_call_operand.vmem [shape: f32[1,32], index: 11, kind: input, shape index: {}]   ;;  %s3079_s12 = inlined_call_operand.hbm [shape: f32[32,64], index: 12, kind: input, shape index: {}]   ;;  %s3080_s13 = inlined_call_operand.vmem [shape: f32[1,64], index: 13, kind: input, shape index: {}]   ;;  %s3081_s14 = inlined_call_operand.vmem [shape: f32[64,32], index: 14, kind: input, shape index: {}]   ;;  %s3082_s15 = inlined_call_operand.vmem [shape: f32[1,32], index: 15, kind: input, shape index: {}]   ;;  %s3083_s16 = inlined_call_operand.vmem [shape: f32[1,32], index: 16, kind: input, shape index: {}]   ;;  %s3084_s17 = inlined_call_operand.vmem [shape: f32[1,32], index: 17, kind: input, shape index: {}]   ;;  %s3085_s18 = inlined_call_operand.hbm [shape: f32[2,8,32], index: 18, kind: output, shape index: {}]  }
   0x1   :  { %3102 = sst [smem:[#allocation22_spill]] %s3067_s0 }
   0x2   :  { %3103 = sst [smem:[#allocation23_spill]] %s3068_s1 }
   0x3   :  { %3104 = sst [smem:[#allocation24_spill]] %s3069_s2 }
   0x4   :  { %3105 = sst [smem:[#allocation25_spill]] %s3075_s8 }
   0x5   :  { %3106 = sst [smem:[#allocation26_spill]] %s3079_s12 }
   0x6   :  { %3107 = sst [smem:[#allocation27_spill]] %s3080_s13 }
   0x7   :  { %3108 = sst [smem:[#allocation28_spill]] %s3082_s15 }
   0x8   :  { %3109 = sst [smem:[#allocation29_spill]] %s3083_s16 }
   0x9   :  { %3110 = sst [smem:[#allocation30_spill]] %s3084_s17 }
   0xa   :  { %3111 = sst [smem:[#allocation31_spill]] %s3085_s18 }
   0xb   :  { %23 = vsyncpa [#allocation3], 0 }
   0xc   :  { %25 = vsyncpa [#allocation3 + $0x1], 0 }
   0xd   :  { %26 = vsyncpa [#allocation6], 0 }
   0xe   :  { %28 = vsyncpa [#allocation6 + $0x1], 0 }
   0xf   :  { %29 = vsyncpa [#allocation9], 0 }
  0x10   :  { %30 = vsyncpa [#allocation4], 0 }
  0x11   :  { %32 = vsyncpa [#allocation4 + $0x1], 0  ;;  %s2642_s27 = smov 0   ;;  %s2644_s28 = smov 0  }
  0x12   :  { %s2646_s29 = smov 0   ;;  %s2648_s30 = smov 0  }
  0x13 LB: > { %3112 = sst [smem:[#allocation16_spill]] %s2518_s27  ;;  %s2663_s0 = sadd.s32 4294967295, %s2530_s30   ;;  %s2530_s30 = sphi %s2648_s30, %s3149_s30   ;;  %s2526_s29 = sphi %s2646_s29, %s3151_s29   ;;  %s2522_s28 = sphi %s2644_s28, %s3153_s28   ;;  %s2518_s27 = sphi %s2642_s27, %s3152_s27  }
  0x14   : > { %3113 = sst [smem:[#allocation17_spill]] %s2526_s29  ;;  %s2035_s19 = sadd.s32 4294967294, %s2530_s30  }
  0x15   : > { %p58_p0 = scmp.ne.s32.totalorder %s2522_s28, %s2518_s27  ;;  %p3091_p1 = scmp.eq.s32.totalorder %s2663_s0, 0 }
  0x16   : > { %p450_p3 = scmp.eq.s32.totalorder %s2035_s19, 1  ;;  %p2036_p5 = scmp.ge.s32.totalorder %s2530_s30, 1 }
  0x17   : > { %p2672_p4 = por %p3091_p1, %p58_p0  ;;  %p457_p7 = scmp.lt.s32.totalorder %s2530_s30, 3 }
  0x18   : > { %p2677_p6 = por %p450_p3, %p58_p0  ;;  %s2532_s22 = smov [#allocation7]  }
  0x19   : > { %s3114_s1 = scalar_select %p2672_p4, 1, 0 }
  0x1a   : > { %s3115_s20 = scalar_select %p2677_p6, 1, 0 }
  0x1b   : > { %p2682_p8 = pnand %p2036_p5, %p457_p7  ;;  %s487_s2 = sshll.u32 %s2532_s22, 4  ;;  %s488_s2 = int_to_ptr.vmem [resolvable:$true] %s487_s2 }
  0x1c   : > { %3116 = sst [smem:[#allocation18_spill]] %s3115_s20  ;;  %s2533_s24 = smov [#allocation8]  }
  0x1d   : > { %s3117_s21 = scalar_select %p2682_p8, 1, 0 }
  0x1e   : > { %p2258_p9 = pneg %p2682_p8  ;;  %s509_s25 = sshll.u32 %s2533_s24, 4  ;;  %s510_s25 = int_to_ptr.vmem [resolvable:$true] %s509_s25 }
  0x1f   : > { %s2357_s26 = scalar_lea.vmem %s488_s2, 512  ;;  %p2365_p5 = scmp.lt.s32.totalorder %s488_s2, %s488_s2 }
  0x20   : > { %p2691_p11 = pnand %p2258_p9, %p3091_p1  ;;  %p2358_p13 = scmp.ne.s32.totalorder %s488_s2, %s2357_s26 }
  0x21   : > { %p2366_p7 = scmp.lt.s32.totalorder %s2357_s26, %s2357_s26 }
  0x22   : > { %p2348_p12 = pneg %p2691_p11 }
  0x23   : > { %p2367_p10 = por %p2366_p7, %p2365_p5 }
  0x24   : > { %p2360_p0 = pnand %p2358_p13, %p2348_p12 }
  0x26   : > { %p2361_p3 = pneg %p2360_p0 }
  0x28   : > { %p2368_p9 = pnand %p2367_p10, %p2361_p3 }
  0x2a   : > { %2371 = shalt.err (!%p2368_p9)
}
  0x2b   : > { %s2534_s19 = smov 128   ;;  %s2535_s22 = smov 8  }
  0x2c   : > { %s3119_s8 = sld [smem:[#allocation25_spill]]  ;;  %s2383_s27 = scalar_lea.vmem %s510_s25, 512 }
  0x2d   : > { %p2384_p1 = scmp.ne.s32.totalorder %s510_s25, %s2383_s27  ;;  %p2391_p2 = scmp.lt.s32.totalorder %s510_s25, %s510_s25 }
  0x2e   : > { %p2392_p6 = scmp.lt.s32.totalorder %s2383_s27, %s2383_s27 }
  0x2f   : > { %p2386_p13 = pnand %p2384_p1, %p2348_p12 }
  0x30   : > { %p2393_p5 = por %p2392_p6, %p2391_p2 }
  0x31   : > { %p2387_p0 = pneg %p2386_p13 }
  0x32   : > { %2261 = dma.hbm_to_vmem [thread:$0]  (!%p2691_p11), %s3119_s8, 512, %s488_s2, [#allocation6], %s2534_s19, %s2534_s19, %s2535_s22  }
  0x33   : > { %p2394_p10 = pnand %p2393_p5, %p2387_p0 }
  0x35   : > { %2397 = shalt.err (!%p2394_p10)
}
  0x36   : > { %s3120_s12 = sld [smem:[#allocation26_spill]]  ;;  %s2714_s27 = sadd.s32 1, %s2530_s30  }
  0x37   : > { %3121 = sst [smem:[#allocation19_spill]] %s2714_s27  ;;  %s45_s20 = sadd.s32 1, %s2526_s29 }
  0x38   : > { %s42_s2 = ssub.s32 %s2530_s30, %s2714_s27  ;;  %p52_p1 = scmp.ne.s32.totalorder %s2526_s29, %s2522_s28 }
  0x39   : > { %p43_p2 = scmp.eq.s32.totalorder %s42_s2, 0  ;;  %p53_p6 = scmp.eq.s32.totalorder %s2530_s30, 0 }
  0x3a   : > { %p3122_p12 = scmp.eq.s32.totalorder %s2663_s0, 1  ;;  %p2278_p7 = scmp.lt.s32.totalorder %s2530_s30, 2 }
  0x3b   : > { %s2730_s23 = scalar_select %p43_p2, %s2526_s29, %s45_s20  }
  0x3c   : > { %2264 = dma.hbm_to_vmem [thread:$0]  (!%p2691_p11), %s3120_s12, 512, %s510_s25, [#allocation9], %s2534_s19, %s2534_s19, %s2535_s22  }
  0x3d   : > { %p2724_p3 = por %p3122_p12, %p52_p1  ;;  %3125 = sst [smem:[#allocation21_spill]] %s2730_s23 }
  0x3e   : > { %p54_p9 = por %p53_p6, %p52_p1  ;;  %s2733_s24 = sand.u32 1, %s2526_s29  }
  0x3f   : > { %s3123_s18 = scalar_select %p2724_p3, 1, 0 }
  0x40   : > { %s2040_s25 = sshll.u32 %s2733_s24, 3  ;;  %s2041_s19 = sshll.u32 %s2530_s30, 7 }
  0x41   : > { %3124 = sst [smem:[#allocation20_spill]] %s3123_s18  ;;  %s542_s12 = scalar_lea.vmem [#allocation2], %s2040_s25 }
  0x42   : > { %s3126_s8 = sld [smem:[#allocation22_spill]]  ;;  %s549_s27 = sshll.u32 %s542_s12, 4  ;;  %s2742_s27 = int_to_ptr.vmem [resolvable:$true] %s549_s27 }
  0x43   : > { %p2744_p11 = pnand %p2278_p7, %p54_p9  ;;  %s539_s29 = scalar_lea.sflag [#allocation3], %s2733_s24 }
  0x45   : > { %p2400_p0 = pneg %p2744_p11 }
  0x48   : > { %s2740_s2 = scalar_lea.hbm %s3126_s8, %s2041_s19  ;;  %s2403_s19 = scalar_lea.hbm %s3126_s8, 256 }
  0x49   : > { %s2398_s17 = scalar_lea.hbm %s2740_s2, 128  ;;  %p2404_p1 = scmp.lt.s32.totalorder %s2740_s2, %s3126_s8 }
  0x4a   : > { %p2399_p13 = scmp.ne.s32.totalorder %s2740_s2, %s2398_s17  ;;  %p2405_p2 = scmp.lt.s32.totalorder %s2403_s19, %s2398_s17 }
  0x4c   : > { %p2401_p5 = pnand %p2400_p0, %p2399_p13  ;;  %p2406_p6 = por %p2405_p2, %p2404_p1 }
  0x4e   : > { %p2402_p10 = pneg %p2401_p5 }
  0x50   : > { %p2407_p12 = pnand %p2406_p6, %p2402_p10 }
  0x52   : > { %2410 = shalt.err (!%p2407_p12)
}
  0x53   : > { %s2411_s23 = scalar_lea.vmem %s2742_s27, 128  ;;  %s2536_s25 = smov [#allocation2]  }
  0x54   : > { %p2412_p7 = scmp.ne.s32.totalorder %s2742_s27, %s2411_s23  ;;  %s2416_s12 = sshll.u32 %s2536_s25, 4  ;;  %s2417_s12 = int_to_ptr.vmem [resolvable:$false] %s2416_s12 }
  0x55   : > { %s2418_s16 = scalar_lea.vmem %s2417_s12, 256  ;;  %p2419_p5 = scmp.lt.s32.totalorder %s2742_s27, %s2417_s12 }
  0x56   : > { %p2414_p9 = pnand %p2412_p7, %p2400_p0  ;;  %p2420_p3 = scmp.lt.s32.totalorder %s2418_s16, %s2411_s23 }
  0x58   : > { %p2415_p13 = pneg %p2414_p9  ;;  %p2421_p4 = por %p2420_p3, %p2419_p5 }
  0x5a   : > { %p2422_p1 = pnand %p2421_p4, %p2415_p13 }
  0x5c   : > { %2425 = shalt.err (!%p2422_p1)
}
  0x5d   : > { %2268 = dma.hbm_to_vmem [thread:$0]  (!%p2744_p11), %s2740_s2, 128, %s2742_s27, %s539_s29  }
  0x5e   : > { %s2042_s17 = sshll.u32 %s2530_s30, 4  ;;  %s559_s19 = scalar_lea.vmem [#allocation5], %s2733_s24 }
  0x5f   : > { %s566_s22 = sshll.u32 %s559_s19, 4  ;;  %s3128_s8 = sld [smem:[#allocation23_spill]]  ;;  %s567_s22 = int_to_ptr.vmem [resolvable:$true] %s566_s22 }
  0x60   : > { %s3129_s16 = sand.u32 1, %s2530_s30  }
  0x61   : > { %s557_s23 = scalar_lea.sflag [#allocation6], %s3129_s16 }
  0x65   : > { %s564_s12 = scalar_lea.hbm %s3128_s8, %s2042_s17  ;;  %s2431_s29 = scalar_lea.hbm %s3128_s8, 32 }
  0x66   : > { %s2426_s18 = scalar_lea.hbm %s564_s12, 16  ;;  %p2432_p2 = scmp.lt.s32.totalorder %s564_s12, %s3128_s8 }
  0x67   : > { %p2427_p4 = scmp.ne.s32.totalorder %s564_s12, %s2426_s18  ;;  %p2433_p6 = scmp.lt.s32.totalorder %s2431_s29, %s2426_s18 }
  0x69   : > { %p2429_p3 = pnand %p2427_p4, %p2400_p0  ;;  %p2434_p12 = por %p2433_p6, %p2432_p2 }
  0x6b   : > { %p2430_p10 = pneg %p2429_p3 }
  0x6d   : > { %p2435_p7 = pnand %p2434_p12, %p2430_p10 }
  0x6f   : > { %2438 = shalt.err (!%p2435_p7)
}
  0x70   : > { %s2439_s2 = scalar_lea.vmem %s567_s22, 16  ;;  %s2537_s17 = smov [#allocation5]  }
  0x71   : > { %p2440_p9 = scmp.ne.s32.totalorder %s567_s22, %s2439_s2  ;;  %s2444_s19 = sshll.u32 %s2537_s17, 4  ;;  %s2445_s19 = int_to_ptr.vmem [resolvable:$false] %s2444_s19 }
  0x72   : > { %s2446_s13 = scalar_lea.vmem %s2445_s19, 32  ;;  %p2447_p1 = scmp.lt.s32.totalorder %s567_s22, %s2445_s19 }
  0x73   : > { %p2442_p13 = pnand %p2440_p9, %p2400_p0  ;;  %p2448_p4 = scmp.lt.s32.totalorder %s2446_s13, %s2439_s2 }
  0x75   : > { %p2443_p5 = pneg %p2442_p13  ;;  %p2449_p3 = por %p2448_p4, %p2447_p1 }
  0x77   : > { %p2450_p8 = pnand %p2449_p3, %p2443_p5 }
  0x79   : > { %2453 = shalt.err (!%p2450_p8)
}
  0x7a   : > { %2271 = dma.hbm_to_vmem [thread:$0]  (!%p2744_p11), %s564_s12, 16, %s567_s22, %s557_s23  }
  0x7b   : > { %p3130_p10 = scmp.ne.s32.totalorder %s3117_s21, 0 }
  0x7c   : > { %s2798_s15 = sand.u32 (!%p3130_p10), 1, %s2522_s28   ;;  %p3131_p0 = scmp.ne.s32.totalorder (!%p3130_p10), %s3114_s1, 0 }
  0x7d   : > { %575 = sbr.rel (%p3130_p10) target bundleno = 2523 (0x9db), region = 92  ;;  %s2044_s18 = sshll.u32 (!%p3130_p10), %s2798_s15, 3 }
  0x7e   : > { %s578_s26 = scalar_lea.sflag (!%p3130_p10), [#allocation3], %s2798_s15  ;;  %s581_s25 = scalar_lea.vmem (!%p3130_p10), [#allocation2], %s2044_s18 }
  0x82   : > { %2497 = dma.done.wait (%p3131_p0), %s578_s26, 128  }
  0x83   : > { %2499 = vsyncadd (%p3131_p0), %s578_s26, 4294967168  ;;  %s586_s21 = sand.u32 1, %s2663_s0   ;;  %s589_s22 = scalar_lea.vmem [#allocation5], %s2798_s15 }
  0x84   : > { %s587_s20 = scalar_lea.sflag [#allocation6], %s586_s21 }
  0x85   : > { %2501 = dma.done.wait (%p3131_p0), %s587_s20, 16  }
  0x86   : > { %2503 = vsyncadd (%p3131_p0), %s587_s20, 4294967280  ;;  %p3132_p8 = scmp.eq.s32.totalorder %s2663_s0, 0 }
  0x88   : > { %2505 = dma.done.wait (%p3132_p8), [#allocation6], 512   ;;  %p3133_p11 = pmov %p3132_p8 }
  0x89   : > { %p3134_p2 = pmov %p3132_p8 }
  0x8a   : > { %2507 = vsyncadd (%p3133_p11), [#allocation6], 4294966784 }
  0x8b   : > { %2509 = dma.done.wait (%p3134_p2), [#allocation9], 512   ;;  %p3135_p6 = pmov %p3134_p2 }
  0x8c   : > { %v2538_v0 = vmov 0.0   ;;  %vm2539_vm0 = vmmov 0   ;;  %s3136_s16 = sld [smem:[#allocation24_spill]]  ;;  %v2842_v5 = vld [vmem:[%s581_s25] sm:$0xff]  ;;  %vm667_vm1 = vcmask 261120   ;;  %v744_v6 = vld [vmem:[%s3071_s4 + $0x18] sm:$0xff]  ;;  %v983_v32 = vlaneseq }
  0x8d   : > { %2511 = vsyncadd (%p3135_p6), [#allocation9], 4294966784  ;;  %2130 = vmatprep.subr.mxu1 %v2538_v0  ;;  %2138 = vmatprep.mubr.msk.f32.mxu1 %vm2539_vm0, %v2538_v0  ;;  %v743_v7 = vld [vmem:[%s3071_s4 + $0x10] sm:$0xff]  ;;  %v742_v8 = vld [vmem:[%s3071_s4 + $0x8] sm:$0xff]  ;;  %vm904_vm2 = vcmask 64512   ;;  %s2540_s1 = smov 112  }
  0x8e   : > { %2152 = vmatprep.subr.mxu0 %v2538_v0  ;;  %2160 = vmatprep.mubr.msk.f32.mxu0 %vm2539_vm0, %v2538_v0  ;;  %v741_v9 = vld [vmem:[%s3071_s4] sm:$0xff]  ;;  %v825_v10 = vld [vmem:[%s3073_s6 + $0x18] sm:$0xff]  ;;  %v824_v11 = vld [vmem:[%s3073_s6 + $0x10] sm:$0xff]  ;;  %s2541_s12 = smov 120   ;;  %s2542_s23 = smov 104   ;;  %v984_v33 = vshrl.u32 %v983_v32, 7 }
  0x8f   : > { %2153 = vmatpush3.msra.mxu0 %v825_v10  ;;  %v823_v12 = vld [vmem:[%s3073_s6 + $0x8] sm:$0xff]  ;;  %v822_v13 = vld [vmem:[%s3073_s6] sm:$0xff]  ;;  %s2544_s24 = smov 16   ;;  %s2545_s2 = smov 24   ;;  %vm1588_vm3 = vcmask 130048   ;;  %vm1590_vm4 = vcmask 195584  }
  0x90   : > { %2154 = vmatprep.subr.mxu0 %v2538_v0  ;;  %v2050_v16 = vld [vmem:[%s3072_s5] ss:$0 sm:$0xff]  ;;  %v985_v36 = vsub.s32 0, %v984_v33  ;;  %v1595_v33 = vld [vmem:[#allocation7 + $0x18] sm:$0xff]  ;;  %vm1807_vm5 = vcmask 523264   ;;  %s3140_s19 = sld [smem:[#allocation29_spill]] }
  0x91   : > { %2155 = vmatpush3.msra.mxu0 %v824_v11  ;;  %v2048_v19 = vld [vmem:[%s3070_s3] ss:$0 sm:$0xff]  ;;  %s3141_s21 = sld [smem:[#allocation30_spill]]  ;;  %s2077_s25 = sshll.u32 %s2663_s0, 7 }
  0x92   : > { %v659_v1 = vld [vmem:[%s3136_s16 + $0x18] sm:$0xff]  ;;  %v658_v2 = vld [vmem:[%s3136_s16 + $0x10] sm:$0xff]  ;;  %v657_v3 = vld [vmem:[%s3136_s16 + $0x8] sm:$0xff]  ;;  %2156 = vmatprep.subr.mxu0 %v2538_v0  ;;  %s653_s20 = scalar_lea.vmem [#allocation10], %s2044_s18  ;;  %s3142_s29 = sld [smem:[#allocation31_spill]] }
  0x93   : > { %2131 = vmatpush3.msra.mxu1 %v659_v1  ;;  %v656_v4 = vld [vmem:[%s3136_s16] sm:$0xff]  ;;  %2157 = vmatpush3.msra.mxu0 %v823_v12 }
  0x94   : > { %2132 = vmatprep.subr.mxu1 %v2538_v0  ;;  %2158 = vmatprep.subr.mxu0 %v2538_v0  ;;  %v2052_v22 = vld [vmem:[%s3074_s7] ss:$0 sm:$0xff] }
  0x95   : > { %2133 = vmatpush3.msra.mxu1 %v658_v2  ;;  %2159 = vmatpush3.msra.mxu0 %v822_v13  ;;  %v655_v34 = vld [vmem:[%s589_s22] sm:$0x1]  ;;  %s2543_s22 = smov 8  }
  0x96   : > { %2134 = vmatprep.subr.mxu1 %v2538_v0  ;;  %2161 = vmatmul.mubr.msk.f32.vlgmr.msra.gmra.mxu0 %vm667_vm1, %v2842_v5  ;;  %v903_v35 = vmul.f32 -1e+09, %v655_v34  ;;  %v1594_v34 = vld [vmem:[#allocation7 + $0x10] sm:$0xff] }
  0x97   : > { %2135 = vmatpush3.msra.mxu1 %v657_v3  ;;  %2173 = vmatprep.subr.mxu0 %v2538_v0 }
  0x98   : > { %2136 = vmatprep.subr.mxu1 %v2538_v0  ;;  %2175 = vmatprep.mubr.msk.f32.mxu0 %vm2539_vm0, %v2538_v0  ;;  %v986_v37 = vrot.slane %v903_v35, %v985_v36  ;;  %v1593_v35 = vld [vmem:[#allocation7 + $0x8] sm:$0xff]  ;;  %v1592_v36 = vld [vmem:[#allocation7] sm:$0xff]  ;;  %s1924_s27 = scalar_lea.hbm %s3142_s29, %s2077_s25 }
  0x99   : > { %2137 = vmatpush3.msra.mxu1 %v656_v4 }
  0x9a   : > { %2139 = vmatmul.mubr.msk.f32.vlgmr.msra.gmra.mxu1 %vm667_vm1, %v2842_v5  ;;  %2141 = vmatprep.subr.mxu1 %v2538_v0 }
  0x9b   : > { %2142 = vmatpush3.msra.mxu1 %v744_v6  ;;  %2149 = vmatprep.mubr.msk.f32.mxu1 %vm2539_vm0, %v2538_v0 }
  0x9c   : > { %2143 = vmatprep.subr.mxu1 %v2538_v0 }
  0x9d   : > { %2144 = vmatpush3.msra.mxu1 %v743_v7 }
  0x9e   : > { %2145 = vmatprep.subr.mxu1 %v2538_v0 }
  0x9f   : > { %2146 = vmatpush3.msra.mxu1 %v742_v8 }
  0xa0   : > { %2147 = vmatprep.subr.mxu1 %v2538_v0 }
  0xa1   : > { %2148 = vmatpush3.msra.mxu1 %v741_v9 }
  0xa2   : > { %2150 = vmatmul.mubr.msk.f32.vlgmr.msra.gmra.mxu1 %vm667_vm1, %v2842_v5  ;;  %2163 = vmatprep.subr.mxu1 %v2538_v0 }
  0xa3   : > { %2165 = vmatprep.mubr.msk.f32.mxu1 %vm2539_vm0, %v2538_v0 }
 0x156   : > { %v899_v23 = vpop.f32.mrf.mxu0 }
 0x157   : > { %v2910_v24 = vadd.f32 %v2052_v22, %v899_v23 }
 0x158   : > { %v2162_v25 = vpop.f32.mrf.mxu0 }
 0x15a   : > { %v737_v14 = vpop.f32.mrf.mxu1 }
 0x15b   : > { %v738_v21 = vadd.f32 %v2048_v19, %v737_v14 }
 0x15c   : > { %v2140_v15 = vpop.f32.mrf.mxu1 }
 0x162   : > { %v818_v17 = vpop.f32.mrf.mxu1 }
 0x163   : > { %v819_v18 = vadd.f32 %v2050_v16, %v818_v17 }
 0x164   : > { %v2151_v20 = vpop.f32.mrf.mxu1 }
 0x165   : > { %1243 = vrot.lane.b32.xlu1 %v819_v18, %s2540_s1  ;;  %1075 = vrot.lane.b32.xlu0 %v819_v18, %s2541_s12 }
 0x166   : > { %2164 = vmatpush3.xpose.msk.msra.mxu1 %vm904_vm2, %v819_v18 }
 0x167   : > { %2168 = vmatprep.subr.mxu1 %v2538_v0 }
 0x169   : > { %2166 = vmatmul.mubr.msk.f32.vlgmr.msra.gmra.mxu1 %vm904_vm2, %v738_v21  ;;  %1241 = vrot.lane.b32.xlu1 %v738_v21, %s2540_s1 }
 0x16a   : > { %1073 = vrot.lane.b32.xlu0 %v738_v21, %s2541_s12  ;;  %2170 = vmatprep.mubr.msk.f32.mxu1 %vm2539_vm0, %v2538_v0 }
 0x16b   : > { %2169 = vmatpush3.msra.mxu1 %v2910_v24 }
 0x16c   : > { %2178 = vmatprep.subr.mxu1 %v2538_v0 }
 0x16d   : > { %1408 = vrot.lane.b32.xlu1 %v738_v21, %s2542_s23 }
 0x16e   : > { %1410 = vrot.lane.b32.xlu0 %v819_v18, %s2542_s23 }
 0x1d7   : > { %v1076_v26 = vpop.permute.xlu0 %1075  ;;  %v1244_v27 = vpop.permute.xlu1 %1243 }
 0x1d8   : > { %2174 = vmatpush3.xpose.msk.msra.mxu0 %vm904_vm2, %v1076_v26 }
 0x1d9   : > { %2183 = vmatprep.subr.mxu0 %v2538_v0 }
 0x1db   : > { %v1242_v29 = vpop.permute.xlu1 %1241 }
 0x1dc   : > { %v1074_v28 = vpop.permute.xlu0 %1073 }
 0x1dd   : > { %2176 = vmatmul.mubr.msk.f32.vlgmr.msra.gmra.mxu0 %vm904_vm2, %v1074_v28 }
 0x1de   : > { %2184 = vmatpush3.xpose.msk.msra.mxu0 %vm904_vm2, %v1244_v27  ;;  %2185 = vmatprep.mubr.msk.f32.mxu0 %vm2539_vm0, %v2538_v0 }
 0x1df   : > { %2193 = vmatprep.subr.mxu0 %v2538_v0  ;;  %v1409_v31 = vpop.permute.xlu1 %1408 }
 0x1e0   : > { %v1411_v30 = vpop.permute.xlu0 %1410 }
 0x1e1   : > { %2186 = vmatmul.mubr.msk.f32.vlgmr.msra.gmra.mxu0 %vm904_vm2, %v1242_v29 }
 0x1e2   : > { %2194 = vmatpush3.xpose.msk.msra.mxu0 %vm904_vm2, %v1411_v30  ;;  %2195 = vmatprep.mubr.msk.f32.mxu0 %vm2539_vm0, %v2538_v0 }
 0x1e3   : > { %2203 = vmatprep.subr.mxu0 %v2538_v0 }
 0x1e5   : > { %2196 = vmatmul.mubr.msk.f32.vlgmr.msra.gmra.mxu0 %vm904_vm2, %v1409_v31 }
 0x1e6   : > { %2211 = vmatprep.mubr.msk.f32.mxu0 %vm2539_vm0, %v2538_v0  ;;  %2204 = vmatpush3.msra.mxu0 %v1595_v33 }
 0x1e7   : > { %2205 = vmatprep.subr.mxu0 %v2538_v0 }
 0x1e8   : > { %2206 = vmatpush3.msra.mxu0 %v1594_v34 }
 0x1e9   : > { %2207 = vmatprep.subr.mxu0 %v2538_v0 }
 0x1ea   : > { %2208 = vmatpush3.msra.mxu0 %v1593_v35 }
 0x1eb   : > { %2209 = vmatprep.subr.mxu0 %v2538_v0 }
 0x1ec   : > { %2210 = vmatpush3.msra.mxu0 %v1592_v36 }
 0x1ed   : > { %2225 = vmatprep.subr.mxu0 %v2538_v0 }
 0x229   : > { %v977_v38 = vpop.f32.mrf.mxu1 }
 0x22a   : > { %v981_v39 = vmul.f32 0.35355338, %v977_v38 }
 0x22b   : > { %v2167_v40 = vpop.f32.mrf.mxu1 }
 0x22c   : > { %v988_v41 = vadd.f32 %v986_v37, %v981_v39 }
 0x22e   : > { %v989_v42 = vsel %vm904_vm2, %v988_v41, -inf }
 0x22f   : > { %990 = vmax.xlane.f32.xlu0 %v989_v42 }
 0x29d   : > { %v1147_v43 = vpop.f32.mrf.mxu0 }
 0x29e   : > { %v1151_v44 = vmul.f32 0.35355338, %v1147_v43 }
 0x29f   : > { %v2177_v45 = vpop.f32.mrf.mxu0 }
 0x2a0   : > { %v1152_v46 = vadd.f32 %v1151_v44, %v986_v37 }
 0x2a1   : > { %v1315_v47 = vpop.f32.mrf.mxu0 }
 0x2a2   : > { %v1319_v48 = vmul.f32 0.35355338, %v1315_v47  ;;  %v1153_v49 = vsel %vm904_vm2, %v1152_v46, -inf }
 0x2a3   : > { %1154 = vmax.xlane.f32.xlu1 %v1153_v49  ;;  %v2187_v50 = vpop.f32.mrf.mxu0  ;;  %v2066_v49 = vld [vmem:[%s3076_s9] ss:$0 sm:$0xff] }
 0x2a4   : > { %v1320_v51 = vadd.f32 %v1319_v48, %v986_v37 }
 0x2a5   : > { %v1482_v52 = vpop.f32.mrf.mxu0 }
 0x2a6   : > { %v1486_v53 = vmul.f32 0.35355338, %v1482_v52  ;;  %v1321_v54 = vsel %vm904_vm2, %v1320_v51, -inf }
 0x2a7   : > { %v2197_v55 = vpop.f32.mrf.mxu0  ;;  %1322 = vmax.xlane.f32.xlu0 %v1321_v54 }
 0x2a8   : > { %v1487_v56 = vadd.f32 %v1486_v53, %v986_v37 }
 0x2aa   : > { %v1488_v57 = vsel %vm904_vm2, %v1487_v56, -inf }
 0x2ab   : > { %1489 = vmax.xlane.f32.xlu0 %v1488_v57 }
 0x2b4   : > { %1165 = vrot.lane.b32.xlu1 %v2910_v24, %s2541_s12 }
 0x2b8   : > { %v991_v58 = vpop.xlane.xlu0 %990 }
 0x2b9   : > { %v992_v59 = vsub.f32 %v988_v41, %v991_v58 }
 0x2bb   : > { %v993_v60 = vmul.f32 1.442695, %v992_v59 }
 0x2bd   : > { %2326 = vpow2.f32 %v993_v60  ;;  %v1710_v60 = vld [vmem:[#allocation8 + $0x18] sm:$0xff] }
 0x2ca   : > { %v2327_v61 = vpop.eup %2326 }
 0x2cb   : > { %v995_v62 = vsel %vm904_vm2, %v2327_v61, 0.0 }
 0x2d8   : > { %996 = vadd.xlane.f32.xlu1 %v995_v62  ;;  %v1708_v62 = vld [vmem:[#allocation8 + $0x8] sm:$0xff] }
 0x32c   : > { %v1155_v63 = vpop.xlane.xlu1 %1154 }
 0x32d   : > { %v1156_v1 = vsub.f32 %v1152_v46, %v1155_v63  ;;  %v1799_v63 = vld [vmem:[%s3081_s14 + $0x38] sm:$0xff] }
 0x32f   : > { %v1157_v2 = vmul.f32 1.442695, %v1156_v1  ;;  %v1798_v1 = vld [vmem:[%s3081_s14 + $0x30] sm:$0xff] }
 0x330   : > { %v1323_v3 = vpop.xlane.xlu0 %1322  ;;  %v1166_v16 = vpop.permute.xlu1 %1165 }
 0x331   : > { %2328 = vpow2.f32 %v1157_v2  ;;  %v1324_v4 = vsub.f32 %v1320_v51, %v1323_v3  ;;  %v1797_v2 = vld [vmem:[%s3081_s14 + $0x28] sm:$0xff]  ;;  %v1796_v3 = vld [vmem:[%s3081_s14 + $0x20] sm:$0xff] }
 0x333   : > { %v1325_v6 = vmul.f32 1.442695, %v1324_v4  ;;  %v1795_v4 = vld [vmem:[%s3081_s14 + $0x18] sm:$0xff] }
 0x334   : > { %v1490_v7 = vpop.xlane.xlu0 %1489 }
 0x335   : > { %2330 = vpow2.f32 %v1325_v6  ;;  %v1491_v8 = vsub.f32 %v1487_v56, %v1490_v7 }
 0x337   : > { %v1492_v9 = vmul.f32 1.442695, %v1491_v8 }
 0x339   : > { %2332 = vpow2.f32 %v1492_v9 }
 0x33e   : > { %v2329_v10 = vpop.eup %2328 }
 0x33f   : > { %v1159_v11 = vsel %vm904_vm2, %v2329_v10, 0.0 }
 0x340   : > { %1160 = vadd.xlane.f32.xlu0 %v1159_v11 }
 0x342   : > { %v2331_v12 = vpop.eup %2330 }
 0x343   : > { %v1327_v13 = vsel %vm904_vm2, %v2331_v12, 0.0 }
 0x344   : > { %1328 = vadd.xlane.f32.xlu1 %v1327_v13 }
 0x346   : > { %v2333_v14 = vpop.eup %2332 }
 0x347   : > { %v1494_v15 = vsel %vm904_vm2, %v2333_v14, 0.0 }
 0x348   : > { %1495 = vadd.xlane.f32.xlu0 %v1494_v15  ;;  %v1794_v15 = vld [vmem:[%s3081_s14 + $0x10] sm:$0xff] }
 0x355   : > { %1499 = vrot.lane.b32.xlu1 %v2910_v24, %s2542_s23  ;;  %s3137_s23 = sld [smem:[#allocation27_spill]] }
 0x35e   : > { %1332 = vrot.lane.b32.xlu0 %v2910_v24, %s2540_s1  ;;  %s1926_s1 = sshll.u32 %s653_s20, 4  ;;  %s1927_s1 = int_to_ptr.vmem [resolvable:$true] %s1926_s1 }
 0x35f   : > { %s2454_s17 = scalar_lea.vmem %s1927_s1, 128 }
 0x360   : > { %p2455_p12 = scmp.ne.s32.totalorder %s1927_s1, %s2454_s17 }
 0x361   : > { %v997_v17 = vpop.xlane.xlu1 %996 }
 0x362   : > { %2334 = vrcp.f32 %v997_v17  ;;  %v1792_v17 = vld [vmem:[%s3081_s14] sm:$0xff] }
 0x36f   : > { %v2335_v18 = vpop.eup %2334 }
 0x370   : > { %v999_v19 = vmul.f32 %v2335_v18, %v2327_v61  ;;  %v1709_v61 = vld [vmem:[#allocation8 + $0x10] sm:$0xff]  ;;  %v2070_v18 = vld [vmem:[%s3137_s23] ss:$0 sm:$0xff] }
 0x372   : > { %2171 = vmatmul.mubr.msk.f32.vlgmr.msra.gmra.mxu1 %vm904_vm2, %v999_v19 }
 0x373   : > { %2179 = vmatpush3.msra.mxu1 %v1166_v16  ;;  %2180 = vmatprep.mubr.msk.f32.mxu1 %vm2539_vm0, %v2538_v0  ;;  %v1793_v16 = vld [vmem:[%s3081_s14 + $0x8] sm:$0xff] }
 0x374   : > { %2188 = vmatprep.subr.mxu1 %v2538_v0 }
 0x3c9   : > { %v1161_v20 = vpop.xlane.xlu0 %1160 }
 0x3ca   : > { %2336 = vrcp.f32 %v1161_v20 }
 0x3cd   : > { %v1329_v21 = vpop.xlane.xlu1 %1328 }
 0x3ce   : > { %2338 = vrcp.f32 %v1329_v21 }
 0x3d1   : > { %v1496_v22 = vpop.xlane.xlu0 %1495  ;;  %v1500_v28 = vpop.permute.xlu1 %1499 }
 0x3d2   : > { %2340 = vrcp.f32 %v1496_v22 }
 0x3d5   : > { %v1333_v25 = vpop.permute.xlu0 %1332 }
 0x3d7   : > { %v2337_v23 = vpop.eup %2336 }
 0x3d8   : > { %v1163_v24 = vmul.f32 %v2337_v23, %v2329_v10  ;;  %v2068_v10 = vld [vmem:[%s3077_s10] ss:$0 sm:$0xff] }
 0x3da   : > { %2181 = vmatmul.mubr.msk.f32.vlgmr.msra.gmra.mxu1 %vm904_vm2, %v1163_v24 }
 0x3db   : > { %v2339_v26 = vpop.eup %2338  ;;  %2189 = vmatpush3.msra.mxu1 %v1333_v25  ;;  %2190 = vmatprep.mubr.msk.f32.mxu1 %vm2539_vm0, %v2538_v0 }
 0x3dc   : > { %2198 = vmatprep.subr.mxu1 %v2538_v0  ;;  %v1331_v27 = vmul.f32 %v2339_v26, %v2331_v12  ;;  %v2069_v12 = vld [vmem:[%s3078_s11] ss:$0 sm:$0xff] }
 0x3de   : > { %2191 = vmatmul.mubr.msk.f32.vlgmr.msra.gmra.mxu1 %vm904_vm2, %v1331_v27 }
 0x3df   : > { %v2341_v29 = vpop.eup %2340  ;;  %2199 = vmatpush3.msra.mxu1 %v1500_v28  ;;  %2200 = vmatprep.mubr.msk.f32.mxu1 %vm2539_vm0, %v2538_v0 }
 0x3e0   : > { %v1498_v30 = vmul.f32 %v2341_v29, %v2333_v14  ;;  %2214 = vmatprep.subr.mxu1 %v2538_v0 }
 0x3e2   : > { %2201 = vmatmul.mubr.msk.f32.vlgmr.msra.gmra.mxu1 %vm904_vm2, %v1498_v30 }
 0x3e3   : > { %2222 = vmatprep.mubr.msk.f32.mxu1 %vm2539_vm0, %v2538_v0  ;;  %2215 = vmatpush3.msra.mxu1 %v1710_v60 }
 0x3e4   : > { %2216 = vmatprep.subr.mxu1 %v2538_v0 }
 0x3e5   : > { %2217 = vmatpush3.msra.mxu1 %v1709_v61 }
 0x3e6   : > { %2218 = vmatprep.subr.mxu1 %v2538_v0 }
 0x3e7   : > { %2219 = vmatpush3.msra.mxu1 %v1708_v62 }
 0x3e8   : > { %2220 = vmatprep.subr.mxu1 %v2538_v0 }
 0x432   : > { %v1069_v31 = vpop.f32.mrf.mxu1 }
 0x434   : > { %v2172_v32 = vpop.f32.mrf.mxu1 }
 0x49a   : > { %v1237_v37 = vpop.f32.mrf.mxu1 }
 0x49b   : > { %1576 = vrot.lane.b32.xlu1 %v1237_v37, %s2543_s22  ;;  %s3138_s22 = sld [smem:[#allocation28_spill]]  ;;  %v2074_v37 = vld [vmem:[%s3140_s19] ss:$0 sm:$0xff]  ;;  %s2546_s19 = smov [#allocation10]  }
 0x49c   : > { %v2182_v38 = vpop.f32.mrf.mxu1  ;;  %s2458_s0 = sshll.u32 %s2546_s19, 4  ;;  %s2459_s0 = int_to_ptr.vmem [resolvable:$false] %s2458_s0 }
 0x49d   : > { %s2460_s18 = scalar_lea.vmem %s2459_s0, 256  ;;  %p2461_p5 = scmp.lt.s32.totalorder %s1927_s1, %s2459_s0 }
 0x49e   : > { %v1404_v39 = vpop.f32.mrf.mxu1  ;;  %p2462_p1 = scmp.lt.s32.totalorder %s2460_s18, %s2454_s17 }
 0x49f   : > { %1580 = vrot.lane.b32.xlu0 %v1404_v39, %s2544_s24  ;;  %s3139_s24 = sld [smem:[#allocation20_spill]]  ;;  %v2075_v39 = vld [vmem:[%s3141_s21] ss:$0 sm:$0xff] }
 0x4a0   : > { %v2192_v40 = vpop.f32.mrf.mxu1  ;;  %p2463_p4 = por %p2462_p1, %p2461_p5 }
 0x4a1   : > { %v2072_v23 = vld [vmem:[%s3138_s22] ss:$0 sm:$0xff]  ;;  %s3143_s22 = smov %s3142_s29 }
 0x4a2   : > { %v1571_v41 = vpop.f32.mrf.mxu1 }
 0x4a3   : > { %1584 = vrot.lane.b32.xlu1 %v1571_v41, %s2545_s2  ;;  %s1913_s2 = scalar_lea.sflag [#allocation4], %s2798_s15 }
 0x4a4   : > { %v2202_v42 = vpop.f32.mrf.mxu1 }
 0x4a5   : > { %p3144_p7 = scmp.ne.s32.totalorder %s3139_s24, 0 }
 0x4a7   : > { %p2456_p9 = pnand %p2455_p12, %p3144_p7 }
 0x4a9   : > { %p2457_p13 = pneg %p2456_p9 }
 0x4ab   : > { %p2464_p3 = pnand %p2463_p4, %p2457_p13 }
 0x50d   : > { %v1577_v43 = vpop.permute.xlu1 %1576 }
 0x50e   : > { %v1587_v45 = vsel %vm904_vm2, %v1069_v31, %v1577_v43 }
 0x511   : > { %v1581_v44 = vpop.permute.xlu0 %1580 }
 0x512   : > { %v1589_v46 = vsel %vm1588_vm3, %v1587_v45, %v1581_v44 }
 0x515   : > { %v1585_v47 = vpop.permute.xlu1 %1584 }
 0x516   : > { %v1591_v48 = vsel %vm1590_vm4, %v1589_v46, %v1585_v47 }
 0x517   : > { %2212 = vmatmul.mubr.msk.f32.vlgmr.msra.gmra.mxu0 %vm667_vm1, %v1591_v48 }
 0x518   : > { %2241 = vmatprep.mubr.msk.f32.mxu0 %vm2539_vm0, %v2538_v0  ;;  %2226 = vmatpush3.msra.mxu0 %v1799_v63 }
 0x519   : > { %2227 = vmatprep.subr.mxu0 %v2538_v0 }
 0x51a   : > { %2228 = vmatpush3.msra.mxu0 %v1798_v1 }
 0x51b   : > { %2229 = vmatprep.subr.mxu0 %v2538_v0 }
 0x51c   : > { %2230 = vmatpush3.msra.mxu0 %v1797_v2 }
 0x51d   : > { %2231 = vmatprep.subr.mxu0 %v2538_v0 }
 0x51e   : > { %2232 = vmatpush3.msra.mxu0 %v1796_v3 }
 0x51f   : > { %2233 = vmatprep.subr.mxu0 %v2538_v0 }
 0x520   : > { %2234 = vmatpush3.msra.mxu0 %v1795_v4 }
 0x521   : > { %2235 = vmatprep.subr.mxu0 %v2538_v0 }
 0x522   : > { %2236 = vmatpush3.msra.mxu0 %v1794_v15 }
 0x523   : > { %2237 = vmatprep.subr.mxu0 %v2538_v0 }
 0x524   : > { %2238 = vmatpush3.msra.mxu0 %v1793_v16 }
 0x525   : > { %2239 = vmatprep.subr.mxu0 %v2538_v0 }
 0x526   : > { %2240 = vmatpush3.msra.mxu0 %v1792_v17 }
 0x5d7   : > { %v1672_v50 = vpop.f32.mrf.mxu0 }
 0x5d8   : > { %v1673_v51 = vadd.f32 %v2066_v49, %v1672_v50 }
 0x5d9   : > { %v2213_v52 = vpop.f32.mrf.mxu0 }
 0x5da   : > { %v1676_v53 = vadd.f32 %v1673_v51, %v2842_v5  ;;  %v1707_v5 = vld [vmem:[#allocation8] sm:$0xff] }
 0x5db   : > { %2221 = vmatpush3.msra.mxu1 %v1707_v5 }
 0x5dc   : > { %v1679_v54 = vsel %vm667_vm1, %v1676_v53, 0.0 }
 0x5dd   : > { %1680 = vadd.xlane.f32.xlu0 %v1679_v54 }
 0x666   : > { %v1681_v55 = vpop.xlane.xlu0 %1680 }
 0x667   : > { %v1683_v56 = vmul.f32 0.03125, %v1681_v55 }
 0x669   : > { %v1684_v57 = vsub.f32 %v1676_v53, %v1683_v56 }
 0x66b   : > { %v1685_v58 = vmul.f32 %v1684_v57, %v1684_v57 }
 0x66d   : > { %v1686_v59 = vsel %vm667_vm1, %v1685_v58, 0.0 }
 0x66e   : > { %1687 = vadd.xlane.f32.xlu1 %v1686_v59 }
 0x6f7   : > { %v1688_v6 = vpop.xlane.xlu1 %1687 }
 0x6f8   : > { %v1689_v7 = vmul.f32 0.03125, %v1688_v6 }
 0x6fa   : > { %v1690_v8 = vadd.f32 1e-05, %v1689_v7 }
 0x6fc   : > { %2342 = vrsqrt.f32 %v1690_v8 }
 0x709   : > { %v2343_v9 = vpop.eup %2342 }
 0x70a   : > { %v1692_v11 = vmul.f32 %v2343_v9, %v1684_v57 }
 0x70c   : > { %v1699_v13 = vmul.f32 %v2068_v10, %v1692_v11 }
 0x70e   : > { %v1706_v14 = vadd.f32 %v2069_v12, %v1699_v13 }
 0x710   : > { %2223 = vmatmul.mubr.msk.f32.vlgmr.msra.gmra.mxu1 %vm667_vm1, %v1706_v14 }
 0x7d0   : > { %v1787_v19 = vpop.f32.mrf.mxu1 }
 0x7d1   : > { %v1788_v20 = vadd.f32 %v2070_v18, %v1787_v19 }
 0x7d2   : > { %v2224_v21 = vpop.f32.mrf.mxu1 }
 0x7d3   : > { %v1791_v22 = vmax.f32 %v1788_v20, 0.0 }
 0x7d5   : > { %2242 = vmatmul.mubr.msk.f32.vlgmr.msra.gmra.mxu0 %vm1807_vm5, %v1791_v22 }
 0x895   : > { %v1877_v24 = vpop.f32.mrf.mxu0 }
 0x896   : > { %v1878_v25 = vadd.f32 %v2072_v23, %v1877_v24 }
 0x897   : > { %v2243_v26 = vpop.f32.mrf.mxu0 }
 0x898   : > { %v1881_v27 = vadd.f32 %v1878_v25, %v1706_v14 }
 0x89a   : > { %v1884_v0 = vsel %vm667_vm1, %v1881_v27, 0.0 }
 0x89b   : > { %1885 = vadd.xlane.f32.xlu0 %v1884_v0 }
 0x924   : > { %v1886_v28 = vpop.xlane.xlu0 %1885 }
 0x925   : > { %v1887_v29 = vmul.f32 0.03125, %v1886_v28 }
 0x927   : > { %v1888_v30 = vsub.f32 %v1881_v27, %v1887_v29 }
 0x929   : > { %v1889_v31 = vmul.f32 %v1888_v30, %v1888_v30 }
 0x92b   : > { %v1890_v32 = vsel %vm667_vm1, %v1889_v31, 0.0 }
 0x92c   : > { %1891 = vadd.xlane.f32.xlu0 %v1890_v32 }
 0x9b5   : > { %v1892_v33 = vpop.xlane.xlu0 %1891 }
 0x9b6   : > { %v1893_v34 = vmul.f32 0.03125, %v1892_v33 }
 0x9b8   : > { %v1894_v35 = vadd.f32 1e-05, %v1893_v34 }
 0x9ba   : > { %2344 = vrsqrt.f32 %v1894_v35 }
 0x9c7   : > { %v2345_v36 = vpop.eup %2344 }
 0x9c8   : > { %v1896_v38 = vmul.f32 %v2345_v36, %v1888_v30 }
 0x9ca   : > { %v1903_v40 = vmul.f32 %v2074_v37, %v1896_v38 }
 0x9cc   : > { %v1910_v41 = vadd.f32 %v2075_v39, %v1903_v40 }
 0x9ce   : > { %1911 = vst.msk [vmem:[%s653_s20] sm:$0xff] %vm667_vm1, %v1910_v41 }
 0x9cf   : > { %2467 = shalt.err (!%p2464_p3)
}
 0x9d0   : > { %s2468_s13 = scalar_lea.hbm %s1924_s27, 128  ;;  %s2472_s21 = scalar_lea.hbm %s3143_s22, 256 }
 0x9d1   : > { %p2469_p10 = scmp.ne.s32.totalorder %s1924_s27, %s2468_s13  ;;  %p2473_p11 = scmp.lt.s32.totalorder %s1924_s27, %s3143_s22 }
 0x9d2   : > { %p2474_p2 = scmp.lt.s32.totalorder %s2472_s21, %s2468_s13 }
 0x9d3   : > { %p2470_p0 = pnand %p2469_p10, %p3144_p7 }
 0x9d4   : > { %p2475_p6 = por %p2474_p2, %p2473_p11 }
 0x9d5   : > { %p2471_p8 = pneg %p2470_p0 }
 0x9d7   : > { %p2476_p12 = pnand %p2475_p6, %p2471_p8 }
 0x9d9   : > { %2479 = shalt.err (!%p2476_p12)
}
 0x9da   : > { %2256 = dma.vmem_to_hbm [thread:$0]  (%p3144_p7), %s1927_s1, 128, %s1924_s27, %s1913_s2  }
 0x9db PF: > { %s3145_s12 = sld [smem:[#allocation16_spill]]  ;;  %p3148_p13 = scmp.ge.s32.totalorder %s2530_s30, 2 }
 0x9dc   : > { %s3146_s23 = sld [smem:[#allocation18_spill]] }
 0x9e1   : > { %s1938_s29 = sand.u32 1, %s3145_s12  }
 0x9e2   : > { %p3147_p9 = scmp.ne.s32.totalorder %s3146_s23, 0  ;;  %s1939_s17 = scalar_lea.sflag [#allocation4], %s1938_s29 }
 0x9e4   : > { %p2273_p5 = pnand %p3148_p13, %p3147_p9 }
 0x9e6   : > { %p2274_p1 = pneg %p2273_p5 }
 0x9e8   : > { %2513 = dma.done.wait (%p2274_p1), %s1939_s17, 128  }
 0x9e9   : > { %2515 = vsyncadd (%p2274_p1), %s1939_s17, 4294967168  ;;  %s3149_s30 = sld [smem:[#allocation19_spill]]  ;;  %s3152_s27 = smov %s2522_s28 }
 0x9ea   : > { %s3150_s19 = sld [smem:[#allocation17_spill]] }
 0x9eb   : > { %s3151_s29 = sld [smem:[#allocation21_spill]] }
 0x9ef   : > { %p35_p4 = scmp.ge.s32.totalorder %s3149_s30, 4  }
 0x9f0   : > { %s3153_s28 = smov %s3150_s19 }
 0x9f1   :  { %37 = sbr.rel (!%p35_p4) target bundleno = 19 (0x13), region = 158 }
 0x9f6   :  { %1944 = vsyncpa [#allocation3], 1 }
 0x9f7   :  { %1946 = vsyncpa [#allocation3 + $0x1], 1 }
 0x9f8   :  { %1947 = vsyncpa [#allocation6], 1 }
 0x9f9   :  { %1949 = vsyncpa [#allocation6 + $0x1], 1 }
 0x9fa   :  { %1950 = vsyncpa [#allocation9], 1 }
 0x9fb   :  { %1951 = vsyncpa [#allocation4], 1 }
 0x9fc   :  { %1953 = vsyncpa [#allocation4 + $0x1], 1 }

</bundles_post_ra>
